<compile_context>
chip_gen: v5e
topology: v5e:2x2
jax: 0.10.0
libtpu: 0.0.40
codegen_flags: <defaults>
</compile_context>

<pallas_src>
import jax
import jax.numpy as jnp
from jax import lax
from jax.experimental import pallas as pl
from jax.experimental.pallas import tpu as pltpu


def _round_up(x, m):
    return ((x + m - 1) // m) * m


# ----------------------------------------------------------------------------
# Kernel 1: backbone = flatten + linear   ( [N, K] @ [K, d] + [1, d] -> [N, d] )
# Tiled over (rows, K-reduction) with a VMEM accumulator.
# ----------------------------------------------------------------------------
def _backbone_kernel(x_ref, w_ref, b_ref, o_ref, acc_ref):
    k = pl.program_id(1)

    @pl.when(k == 0)
    def _():
        acc_ref[...] = jnp.zeros_like(acc_ref)

    acc_ref[...] += jnp.dot(x_ref[...], w_ref[...],
                            preferred_element_type=jnp.float32)

    @pl.when(k == pl.num_programs(1) - 1)
    def _():
        o_ref[...] = (acc_ref[...] + b_ref[...]).astype(o_ref.dtype)


def backbone_forward(x_flat, w, b, *, tm_max=256, tk_max=1024, matmul_dtype=None):
    """x_flat: [N, K], w: [K, d], b: [1, d] -> [N, d] f32.

    Tiles chosen so (tm,tk)+(tk,d)+(tm,d) double-buffered stays well inside the
    32 MiB scoped-VMEM budget (safe on v5e/v6e/v7x).  Set matmul_dtype=bf16 for
    realistic sizes to halve HBM traffic (f32 accumulation is kept either way).
    """
    N, K = x_flat.shape
    d = w.shape[1]

    if matmul_dtype is not None:
        x_flat = x_flat.astype(matmul_dtype)
        w = w.astype(matmul_dtype)

    tm = min(tm_max, _round_up(N, 8))      # sublane-aligned row tile
    tk = min(tk_max, _round_up(K, 128))    # lane-aligned reduction tile
    N_pad = _round_up(N, tm)
    K_pad = _round_up(K, tk)

    if N_pad != N or K_pad != K:
        x_flat = jnp.pad(x_flat, ((0, N_pad - N), (0, K_pad - K)))
    if K_pad != K:
        w = jnp.pad(w, ((0, K_pad - K), (0, 0)))

    grid = (N_pad // tm, K_pad // tk)

    out = pl.pallas_call(
        _backbone_kernel,
        out_shape=jax.ShapeDtypeStruct((N_pad, d), jnp.float32),
        grid=grid,
        in_specs=[
            pl.BlockSpec((tm, tk), lambda i, k: (i, k)),
            pl.BlockSpec((tk, d), lambda i, k: (k, 0)),
            pl.BlockSpec((1, d), lambda i, k: (0, 0)),
        ],
        out_specs=pl.BlockSpec((tm, d), lambda i, k: (i, 0)),
        scratch_shapes=[pltpu.VMEM((tm, d), jnp.float32)],
        compiler_params=pltpu.CompilerParams(
            dimension_semantics=("parallel", "arbitrary"),
            vmem_limit_bytes=32 * 1024 * 1024),
    )(x_flat, w, b)
    return out[:N]


# ----------------------------------------------------------------------------
# Kernel 2: ProtoNet head, whole batch in one shot:
#   onehot     = (iota(nC_pad) == supp_y)           (built in-kernel)
#   prototypes = onehot @ supp_f                     (counts divide cancels
#                                                     under L2 normalize)
#   logits     = scale * ( normalize(feat) @ normalize(prototypes)^T + bias )
# ----------------------------------------------------------------------------
def _proto_head_kernel(supp_y_ref, suppf_ref, feat_ref, scale_ref, bias_ref,
                       out_ref):
    supp_y = supp_y_ref[...]          # [B, nSupp] int32
    supp_f = suppf_ref[...]           # [B, nSupp, d] f32
    feat = feat_ref[...]              # [B, nQry,  d] f32

    B, nSupp = supp_y.shape
    nCp = out_ref.shape[-1]           # class axis padded to a multiple of 128

    # one-hot [B, nCp, nSupp] via iota-compare (no HBM one-hot array).
    cls_iota = lax.broadcasted_iota(jnp.int32, (B, nCp, nSupp), 1)
    onehot = (cls_iota == supp_y[:, None, :]).astype(jnp.float32)

    # prototypes = sum of per-class support features.  The reference divides by
    # the per-class count, but that positive scalar cancels under the L2
    # normalize below, so it is omitted (also avoids 0/0 for empty classes).
    protos = jnp.einsum('bcs,bsd->bcd', onehot, supp_f,
                        preferred_element_type=jnp.float32)      # [B, nCp, d]

    # F.normalize(x, p=2, dim=-1, eps=1e-12) == x / max(||x||, eps)
    #                                        == x * rsqrt(max(sumsq, eps^2))
    eps = jnp.float32(1e-12)
    p_norm = protos * lax.rsqrt(jnp.maximum(
        jnp.sum(protos * protos, axis=-1, keepdims=True), eps * eps))
    f_norm = feat * lax.rsqrt(jnp.maximum(
        jnp.sum(feat * feat, axis=-1, keepdims=True), eps * eps))

    scores = jnp.einsum('bqd,bcd->bqc', f_norm, p_norm,
                        preferred_element_type=jnp.float32)      # [B, nQry, nCp]

    scale = scale_ref[0]
    bias = bias_ref[0]
    out_ref[...] = (scale * (scores + bias)).astype(out_ref.dtype)


def proto_head(supp_y, supp_f, feat, scale_cls, bias, num_classes):
    """supp_y: [B, nSupp] int32, supp_f: [B, nSupp, d], feat: [B, nQry, d].
    Returns logits [B, nQry, num_classes]."""
    B, nQry, d = feat.shape
    nCp = _round_up(max(int(num_classes), 1), 128)   # lane-dense logits output

    out = pl.pallas_call(
        _proto_head_kernel,
        out_shape=jax.ShapeDtypeStruct((B, nQry, nCp), jnp.float32),
        in_specs=[
            pl.BlockSpec(memory_space=pltpu.MemorySpace.VMEM),   # supp_y
            pl.BlockSpec(memory_space=pltpu.MemorySpace.VMEM),   # supp_f
            pl.BlockSpec(memory_space=pltpu.MemorySpace.VMEM),   # feat
            pl.BlockSpec(memory_space=pltpu.MemorySpace.SMEM),   # scale_cls (1,)
            pl.BlockSpec(memory_space=pltpu.MemorySpace.SMEM),   # bias      (1,)
        ],
        out_specs=pl.BlockSpec(memory_space=pltpu.MemorySpace.VMEM),
    )(supp_y.astype(jnp.int32), supp_f, feat, scale_cls, bias)
    return out[:, :, :num_classes]


# ----------------------------------------------------------------------------
# ProtoNet forward (glue in plain JAX, hot paths in Pallas)
# ----------------------------------------------------------------------------
def protonet_forward(params, supp_x, supp_y, x, num_classes):
    """
    supp_x: [B, nSupp, C, H, W] f32
    supp_y: [B, nSupp] int32   (class ids in [0, num_classes))
    x:      [B, nQry, C, H, W] f32
    """
    B, nSupp, C, H, W = supp_x.shape
    nQry = x.shape[1]
    K = C * H * W

    # One backbone pass over support + query rows: shares the weight DMA, the
    # pipeline, and a single kernel launch for both sets.
    rows = jnp.concatenate(
        [supp_x.reshape(B * nSupp, K), x.reshape(B * nQry, K)], axis=0)
    feats = backbone_forward(rows, params["w_feat"], params["b_feat"])
    supp_f = feats[: B * nSupp].reshape(B, nSupp, -1)
    feat = feats[B * nSupp:].reshape(B, nQry, -1)

    # Prototypes + cosine classifier fused in one whole-batch kernel.
    logits = proto_head(supp_y, supp_f, feat,
                        params["scale_cls"], params["bias"], num_classes)
    return logits


if __name__ == "__main__":
    # Small shapes consistent with the module's forward signature.
    B, nSupp, nQry = 2, 8, 8
    C, H, W = 4, 16, 16
    d = 32           # NOTE: multiples of 128 keep the feature lanes dense.
    num_classes = 4  # TODO(synk): reference derives num_classes = supp_y.max()+1
                     # at runtime; JAX needs it static, so it is passed in.

    key = jax.random.PRNGKey(0)
    k1, k2, k3 = jax.random.split(key, 3)

    supp_x = jax.random.normal(k1, (B, nSupp, C, H, W), dtype=jnp.float32)
    x = jax.random.normal(k2, (B, nQry, C, H, W), dtype=jnp.float32)
    # Each class appears twice in the support set (2-shot, 4-way).
    supp_y = jnp.tile(jnp.arange(num_classes, dtype=jnp.int32),
                      (B, nSupp // num_classes))

    # Deterministic parameter init (matches module __init__: bias=0,
    # scale_cls=10; synthetic linear backbone drawn from PRNGKey(0)).
    params = {
        "w_feat": jax.random.normal(k3, (C * H * W, d), dtype=jnp.float32)
                  * (1.0 / jnp.sqrt(jnp.float32(C * H * W))),
        "b_feat": jnp.zeros((1, d), dtype=jnp.float32),
        "bias": jnp.zeros((1,), dtype=jnp.float32),
        "scale_cls": jnp.full((1,), 10.0, dtype=jnp.float32),
    }

    logits = protonet_forward(params, supp_x, supp_y, x, num_classes)
    jax.block_until_ready(logits)
    assert logits.shape == (B, nQry, num_classes)
    print("KERNEL_OK")
</pallas_src>

<mosaic_0001>
module attributes {stable_mosaic.version = 11 : i64} {
  func.func @_backbone_kernel(%arg0: i32, %arg1: i32, %arg2: memref<32x1024xf32, #tpu.memory_space<vmem>>, %arg3: memref<1024x32xf32, #tpu.memory_space<vmem>>, %arg4: memref<1x32xf32, #tpu.memory_space<vmem>>, %arg5: memref<32x32xf32, #tpu.memory_space<vmem>>, %arg6: memref<32x32xf32, #tpu.memory_space<vmem>>) attributes {dimension_semantics = [#tpu.dimension_semantics<parallel>, #tpu.dimension_semantics<arbitrary>], iteration_bounds = array<i64: 1, 1>, scalar_prefetch = 0 : i64, scratch_operands = 1 : i64, tpu.core_type = #tpu.core_type<tc>, window_params = [{transform_indices = @transform_0, window_bounds = array<i64: 32, 1024>}, {transform_indices = @transform_1, window_bounds = array<i64: 1024, 32>}, {pipeline_mode = #tpu.pipeline_mode<synchronous>, transform_indices = @transform_2, window_bounds = array<i64: 1, 32>}, {transform_indices = @transform_3, window_bounds = array<i64: 32, 32>}]} {
    %c0_i32 = arith.constant 0 : i32
    %0 = arith.cmpi eq, %arg1, %c0_i32 : i32
    %1 = arith.extui %0 : i1 to i32
    %c0_i32_0 = arith.constant 0 : i32
    %2 = arith.cmpi ne, %1, %c0_i32_0 : i32
    scf.if %2 {
      %cst_10 = arith.constant 0.000000e+00 : f32
      %12 = vector.broadcast %cst_10 : f32 to vector<32x32xf32>
      %c0_11 = arith.constant 0 : index
      %c0_12 = arith.constant 0 : index
      %13 = vector.load %arg6[%c0_11, %c0_12] : memref<32x32xf32, #tpu.memory_space<vmem>>, vector<32x32xf32>
      tpu.vector_store %arg6[%c0_11, %c0_12], %12 {strides = array<i32>} : memref<32x32xf32, #tpu.memory_space<vmem>>, vector<32x32xf32>,
    } else {
    }
    %c0 = arith.constant 0 : index
    %c0_1 = arith.constant 0 : index
    %3 = vector.load %arg6[%c0, %c0_1] : memref<32x32xf32, #tpu.memory_space<vmem>>, vector<32x32xf32>
    %c0_2 = arith.constant 0 : index
    %c0_3 = arith.constant 0 : index
    %4 = vector.load %arg2[%c0_2, %c0_3] : memref<32x1024xf32, #tpu.memory_space<vmem>>, vector<32x1024xf32>
    %c0_4 = arith.constant 0 : index
    %c0_5 = arith.constant 0 : index
    %5 = vector.load %arg3[%c0_4, %c0_5] : memref<1024x32xf32, #tpu.memory_space<vmem>>, vector<1024x32xf32>
    %cst = arith.constant dense<0.000000e+00> : vector<32x32xf32>
    %6 = tpu.matmul %4, %5, %cst {dimension_numbers = #tpu.dot_dimension_numbers<[1], [0], [0], [1], [0, 0, 1, 1], [], []>} : vector<32x1024xf32>, vector<1024x32xf32>, vector<32x32xf32> -> vector<32x32xf32>
    %7 = arith.addf %3, %6 : vector<32x32xf32>
    %c0_6 = arith.constant 0 : index
    %c0_7 = arith.constant 0 : index
    %8 = vector.load %arg6[%c0_6, %c0_7] : memref<32x32xf32, #tpu.memory_space<vmem>>, vector<32x32xf32>
    tpu.vector_store %arg6[%c0_6, %c0_7], %7 {strides = array<i32>} : memref<32x32xf32, #tpu.memory_space<vmem>>, vector<32x32xf32>,
    %c0_i32_8 = arith.constant 0 : i32
    %9 = arith.cmpi eq, %arg1, %c0_i32_8 : i32
    %10 = arith.extui %9 : i1 to i32
    %c0_i32_9 = arith.constant 0 : i32
    %11 = arith.cmpi ne, %10, %c0_i32_9 : i32
    scf.if %11 {
      %c0_10 = arith.constant 0 : index
      %c0_11 = arith.constant 0 : index
      %12 = vector.load %arg6[%c0_10, %c0_11] : memref<32x32xf32, #tpu.memory_space<vmem>>, vector<32x32xf32>
      %c0_12 = arith.constant 0 : index
      %c0_13 = arith.constant 0 : index
      %13 = vector.load %arg4[%c0_12, %c0_13] : memref<1x32xf32, #tpu.memory_space<vmem>>, vector<1x32xf32>
      %14 = vector.broadcast %13 : vector<1x32xf32> to vector<32x32xf32>
      %15 = arith.addf %12, %14 : vector<32x32xf32>
      %c0_14 = arith.constant 0 : index
      %c0_15 = arith.constant 0 : index
      %16 = vector.load %arg5[%c0_14, %c0_15] : memref<32x32xf32, #tpu.memory_space<vmem>>, vector<32x32xf32>
      tpu.vector_store %arg5[%c0_14, %c0_15], %15 {strides = array<i32>} : memref<32x32xf32, #tpu.memory_space<vmem>>, vector<32x32xf32>,
    } else {
    }
    return
  }
  func.func @transform_0(%arg0: i32, %arg1: i32) -> (i32, i32) {
    %c0_i32 = arith.constant 0 : i32
    return %arg0, %arg1 : i32, i32
  }
  func.func @transform_1(%arg0: i32, %arg1: i32) -> (i32, i32) {
    %c0_i32 = arith.constant 0 : i32
    %c0_i32_0 = arith.constant 0 : i32
    return %arg1, %c0_i32 : i32, i32
  }
  func.func @transform_2(%arg0: i32, %arg1: i32) -> (i32, i32) {
    %c0_i32 = arith.constant 0 : i32
    %c0_i32_0 = arith.constant 0 : i32
    %c0_i32_1 = arith.constant 0 : i32
    return %c0_i32, %c0_i32_0 : i32, i32
  }
  func.func @transform_3(%arg0: i32, %arg1: i32) -> (i32, i32) {
    %c0_i32 = arith.constant 0 : i32
    %c0_i32_0 = arith.constant 0 : i32
    return %arg0, %c0_i32 : i32, i32
  }
}

</mosaic_0001>

<bundles_post_ra>
// kernel: tpu_custom_call.1
= control target key start
LH: loop header
LB: loop body
LE: loop exit
PB: predicated region body
PF: predicated region fallthrough
CT: control target
= control target key end

     0   :  { %s1019_s0 = inlined_call_operand.vmem [shape: f32[32,1024], index: 0, kind: input, shape index: {}]   ;;  %s1020_s1 = inlined_call_operand.vmem [shape: f32[1024,32], index: 1, kind: input, shape index: {}]   ;;  %s1021_s2 = inlined_call_operand.vmem [shape: f32[1,32], index: 2, kind: input, shape index: {}]   ;;  %s1022_s3 = inlined_call_operand.hbm [shape: f32[32,32], index: 3, kind: output, shape index: {}]  }
   0x1   :  { %v75_v0 = vld [vmem:[%s1020_s1 + $0x78] sm:$0xff]  ;;  %v74_v2 = vld [vmem:[%s1020_s1 + $0x70] sm:$0xff]  ;;  %v73_v6 = vld [vmem:[%s1020_s1 + $0x68] sm:$0xff] }
   0x2   :  { %v107_v1 = vld [vmem:[%s1020_s1 + $0x178] sm:$0xff]  ;;  %188 = vmatpush.msra.mxu0 %v75_v0  ;;  %v106_v4 = vld [vmem:[%s1020_s1 + $0x170] sm:$0xff]  ;;  %v105_v8 = vld [vmem:[%s1020_s1 + $0x168] sm:$0xff] }
   0x3   :  { %246 = vmatpush.msra.mxu2 %v107_v1  ;;  %v91_v3 = vld [vmem:[%s1020_s1 + $0xf8] sm:$0xff]  ;;  %v90_v7 = vld [vmem:[%s1020_s1 + $0xf0] sm:$0xff]  ;;  %v89_v10 = vld [vmem:[%s1020_s1 + $0xe8] sm:$0xff] }
   0x4   :  { %v123_v5 = vld [vmem:[%s1020_s1 + $0x1f8] sm:$0xff]  ;;  %217 = vmatpush.msra.mxu1 %v91_v3  ;;  %189 = vmatpush.msra.mxu0 %v74_v2  ;;  %v122_v9 = vld [vmem:[%s1020_s1 + $0x1f0] sm:$0xff]  ;;  %v72_v11 = vld [vmem:[%s1020_s1 + $0x60] sm:$0xff] }
   0x5   :  { %275 = vmatpush.msra.mxu3 %v123_v5  ;;  %247 = vmatpush.msra.mxu2 %v106_v4  ;;  %v104_v12 = vld [vmem:[%s1020_s1 + $0x160] sm:$0xff]  ;;  %v121_v13 = vld [vmem:[%s1020_s1 + $0x1e8] sm:$0xff]  ;;  %v71_v16 = vld [vmem:[%s1020_s1 + $0x58] sm:$0xff] }
   0x6   :  { %218 = vmatpush.msra.mxu1 %v90_v7  ;;  %190 = vmatpush.msra.mxu0 %v73_v6  ;;  %v88_v14 = vld [vmem:[%s1020_s1 + $0xe0] sm:$0xff]  ;;  %v103_v17 = vld [vmem:[%s1020_s1 + $0x158] sm:$0xff]  ;;  %v70_v20 = vld [vmem:[%s1020_s1 + $0x50] sm:$0xff] }
   0x7   :  { %276 = vmatpush.msra.mxu3 %v122_v9  ;;  %248 = vmatpush.msra.mxu2 %v105_v8  ;;  %v120_v15 = vld [vmem:[%s1020_s1 + $0x1e0] sm:$0xff]  ;;  %v87_v18 = vld [vmem:[%s1020_s1 + $0xd8] sm:$0xff]  ;;  %v102_v21 = vld [vmem:[%s1020_s1 + $0x150] sm:$0xff] }
   0x8   :  { %219 = vmatpush.msra.mxu1 %v89_v10  ;;  %191 = vmatpush.msra.mxu0 %v72_v11  ;;  %v119_v19 = vld [vmem:[%s1020_s1 + $0x1d8] sm:$0xff]  ;;  %v86_v22 = vld [vmem:[%s1020_s1 + $0xd0] sm:$0xff]  ;;  %v69_v24 = vld [vmem:[%s1020_s1 + $0x48] sm:$0xff] }
   0x9   :  { %277 = vmatpush.msra.mxu3 %v121_v13  ;;  %249 = vmatpush.msra.mxu2 %v104_v12  ;;  %v118_v23 = vld [vmem:[%s1020_s1 + $0x1d0] sm:$0xff]  ;;  %v101_v25 = vld [vmem:[%s1020_s1 + $0x148] sm:$0xff]  ;;  %v68_v28 = vld [vmem:[%s1020_s1 + $0x40] sm:$0xff] }
   0xa   :  { %220 = vmatpush.msra.mxu1 %v88_v14  ;;  %192 = vmatpush.msra.mxu0 %v71_v16  ;;  %v85_v26 = vld [vmem:[%s1020_s1 + $0xc8] sm:$0xff]  ;;  %v100_v29 = vld [vmem:[%s1020_s1 + $0x140] sm:$0xff]  ;;  %v67_v32 = vld [vmem:[%s1020_s1 + $0x38] sm:$0xff] }
   0xb   :  { %278 = vmatpush.msra.mxu3 %v120_v15  ;;  %250 = vmatpush.msra.mxu2 %v103_v17  ;;  %v117_v27 = vld [vmem:[%s1020_s1 + $0x1c8] sm:$0xff]  ;;  %v84_v30 = vld [vmem:[%s1020_s1 + $0xc0] sm:$0xff]  ;;  %v99_v33 = vld [vmem:[%s1020_s1 + $0x138] sm:$0xff] }
   0xc   :  { %221 = vmatpush.msra.mxu1 %v87_v18  ;;  %193 = vmatpush.msra.mxu0 %v70_v20  ;;  %v116_v31 = vld [vmem:[%s1020_s1 + $0x1c0] sm:$0xff]  ;;  %v83_v34 = vld [vmem:[%s1020_s1 + $0xb8] sm:$0xff]  ;;  %v66_v36 = vld [vmem:[%s1020_s1 + $0x30] sm:$0xff] }
   0xd   :  { %279 = vmatpush.msra.mxu3 %v119_v19  ;;  %251 = vmatpush.msra.mxu2 %v102_v21  ;;  %v115_v35 = vld [vmem:[%s1020_s1 + $0x1b8] sm:$0xff]  ;;  %v98_v37 = vld [vmem:[%s1020_s1 + $0x130] sm:$0xff]  ;;  %v65_v40 = vld [vmem:[%s1020_s1 + $0x28] sm:$0xff] }
   0xe   :  { %222 = vmatpush.msra.mxu1 %v86_v22  ;;  %194 = vmatpush.msra.mxu0 %v69_v24  ;;  %v82_v38 = vld [vmem:[%s1020_s1 + $0xb0] sm:$0xff]  ;;  %v97_v41 = vld [vmem:[%s1020_s1 + $0x128] sm:$0xff]  ;;  %v64_v44 = vld [vmem:[%s1020_s1 + $0x20] sm:$0xff] }
   0xf   :  { %280 = vmatpush.msra.mxu3 %v118_v23  ;;  %252 = vmatpush.msra.mxu2 %v101_v25  ;;  %v114_v39 = vld [vmem:[%s1020_s1 + $0x1b0] sm:$0xff]  ;;  %v81_v42 = vld [vmem:[%s1020_s1 + $0xa8] sm:$0xff]  ;;  %v96_v45 = vld [vmem:[%s1020_s1 + $0x120] sm:$0xff] }
  0x10   :  { %223 = vmatpush.msra.mxu1 %v85_v26  ;;  %195 = vmatpush.msra.mxu0 %v68_v28  ;;  %v113_v43 = vld [vmem:[%s1020_s1 + $0x1a8] sm:$0xff]  ;;  %v80_v46 = vld [vmem:[%s1020_s1 + $0xa0] sm:$0xff]  ;;  %v63_v48 = vld [vmem:[%s1020_s1 + $0x18] sm:$0xff] }
  0x11   :  { %281 = vmatpush.msra.mxu3 %v117_v27  ;;  %253 = vmatpush.msra.mxu2 %v100_v29  ;;  %v112_v47 = vld [vmem:[%s1020_s1 + $0x1a0] sm:$0xff]  ;;  %v95_v49 = vld [vmem:[%s1020_s1 + $0x118] sm:$0xff]  ;;  %v62_v52 = vld [vmem:[%s1020_s1 + $0x10] sm:$0xff] }
  0x12   :  { %224 = vmatpush.msra.mxu1 %v84_v30  ;;  %196 = vmatpush.msra.mxu0 %v67_v32  ;;  %v79_v50 = vld [vmem:[%s1020_s1 + $0x98] sm:$0xff]  ;;  %v94_v53 = vld [vmem:[%s1020_s1 + $0x110] sm:$0xff]  ;;  %v61_v56 = vld [vmem:[%s1020_s1 + $0x8] sm:$0xff] }
  0x13   :  { %282 = vmatpush.msra.mxu3 %v116_v31  ;;  %254 = vmatpush.msra.mxu2 %v99_v33  ;;  %v111_v51 = vld [vmem:[%s1020_s1 + $0x198] sm:$0xff]  ;;  %v78_v54 = vld [vmem:[%s1020_s1 + $0x90] sm:$0xff]  ;;  %v93_v57 = vld [vmem:[%s1020_s1 + $0x108] sm:$0xff] }
  0x14   :  { %225 = vmatpush.msra.mxu1 %v83_v34  ;;  %197 = vmatpush.msra.mxu0 %v66_v36  ;;  %v110_v55 = vld [vmem:[%s1020_s1 + $0x190] sm:$0xff]  ;;  %v77_v58 = vld [vmem:[%s1020_s1 + $0x88] sm:$0xff]  ;;  %v60_v60 = vld [vmem:[%s1020_s1] sm:$0xff] }
  0x15   :  { %283 = vmatpush.msra.mxu3 %v115_v35  ;;  %255 = vmatpush.msra.mxu2 %v98_v37  ;;  %v109_v59 = vld [vmem:[%s1020_s1 + $0x188] sm:$0xff]  ;;  %v92_v61 = vld [vmem:[%s1020_s1 + $0x100] sm:$0xff]  ;;  %v30_v63 = vld [vmem:[%s1019_s0 + $0x10] sm:$0xff] }
  0x16   :  { %226 = vmatpush.msra.mxu1 %v82_v38  ;;  %198 = vmatpush.msra.mxu0 %v65_v40  ;;  %v28_v62 = vld [vmem:[%s1019_s0] sm:$0xff]  ;;  %v171_v0 = vld [vmem:[%s1020_s1 + $0x378] sm:$0xff]  ;;  %v29_v4 = vld [vmem:[%s1019_s0 + $0x8] sm:$0xff] }
  0x17   :  { %284 = vmatpush.msra.mxu3 %v114_v39  ;;  %256 = vmatpush.msra.mxu2 %v97_v41  ;;  %v76_v1 = vld [vmem:[%s1020_s1 + $0x80] sm:$0xff]  ;;  %v139_v3 = vld [vmem:[%s1020_s1 + $0x278] sm:$0xff]  ;;  %v170_v6 = vld [vmem:[%s1020_s1 + $0x370] sm:$0xff] }
  0x18   :  { %227 = vmatpush.msra.mxu1 %v81_v42  ;;  %199 = vmatpush.msra.mxu0 %v64_v44  ;;  %v108_v2 = vld [vmem:[%s1020_s1 + $0x180] sm:$0xff]  ;;  %v31_v5 = vld [vmem:[%s1019_s0 + $0x18] sm:$0xff]  ;;  %v138_v8 = vld [vmem:[%s1020_s1 + $0x270] sm:$0xff] }
  0x19   :  { %285 = vmatpush.msra.mxu3 %v113_v43  ;;  %257 = vmatpush.msra.mxu2 %v96_v45  ;;  %v187_v7 = vld [vmem:[%s1020_s1 + $0x3f8] sm:$0xff]  ;;  %v169_v10 = vld [vmem:[%s1020_s1 + $0x368] sm:$0xff]  ;;  %v186_v11 = vld [vmem:[%s1020_s1 + $0x3f0] sm:$0xff] }
  0x1a   :  { %228 = vmatpush.msra.mxu1 %v80_v46  ;;  %200 = vmatpush.msra.mxu0 %v63_v48  ;;  %v155_v9 = vld [vmem:[%s1020_s1 + $0x2f8] sm:$0xff]  ;;  %v137_v12 = vld [vmem:[%s1020_s1 + $0x268] sm:$0xff]  ;;  %v154_v13 = vld [vmem:[%s1020_s1 + $0x2f0] sm:$0xff] }
  0x1b   :  { %286 = vmatpush.msra.mxu3 %v112_v47  ;;  %258 = vmatpush.msra.mxu2 %v95_v49  ;;  %v168_v14 = vld [vmem:[%s1020_s1 + $0x360] sm:$0xff]  ;;  %v185_v15 = vld [vmem:[%s1020_s1 + $0x3e8] sm:$0xff]  ;;  %v38_v19 = vld [vmem:[%s1019_s0 + $0x50] sm:$0xff] }
  0x1c   :  { %229 = vmatpush.msra.mxu1 %v79_v50  ;;  %201 = vmatpush.msra.mxu0 %v62_v52  ;;  %v136_v16 = vld [vmem:[%s1020_s1 + $0x260] sm:$0xff]  ;;  %v153_v17 = vld [vmem:[%s1020_s1 + $0x2e8] sm:$0xff]  ;;  %v167_v20 = vld [vmem:[%s1020_s1 + $0x358] sm:$0xff] }
  0x1d   :  { %287 = vmatpush.msra.mxu3 %v111_v51  ;;  %259 = vmatpush.msra.mxu2 %v94_v53  ;;  %v36_v18 = vld [vmem:[%s1019_s0 + $0x40] sm:$0xff]  ;;  %v135_v22 = vld [vmem:[%s1020_s1 + $0x258] sm:$0xff]  ;;  %v37_v24 = vld [vmem:[%s1019_s0 + $0x48] sm:$0xff] }
  0x1e   :  { %230 = vmatpush.msra.mxu1 %v78_v54  ;;  %202 = vmatpush.msra.mxu0 %v61_v56  ;;  %v184_v21 = vld [vmem:[%s1020_s1 + $0x3e0] sm:$0xff]  ;;  %v39_v25 = vld [vmem:[%s1019_s0 + $0x58] sm:$0xff]  ;;  %v166_v26 = vld [vmem:[%s1020_s1 + $0x350] sm:$0xff] }
  0x1f   :  { %288 = vmatpush.msra.mxu3 %v110_v55  ;;  %260 = vmatpush.msra.mxu2 %v93_v57  ;;  %v152_v23 = vld [vmem:[%s1020_s1 + $0x2e0] sm:$0xff]  ;;  %v183_v27 = vld [vmem:[%s1020_s1 + $0x3d8] sm:$0xff]  ;;  %v134_v28 = vld [vmem:[%s1020_s1 + $0x250] sm:$0xff] }
  0x20   :  { %231 = vmatpush.msra.mxu1 %v77_v58  ;;  %203 = vmatpush.msra.mxu0 %v60_v60  ;;  %v151_v29 = vld [vmem:[%s1020_s1 + $0x2d8] sm:$0xff]  ;;  %v165_v30 = vld [vmem:[%s1020_s1 + $0x348] sm:$0xff]  ;;  %v182_v31 = vld [vmem:[%s1020_s1 + $0x3d0] sm:$0xff] }
  0x21   :  { %289 = vmatpush.msra.mxu3 %v109_v59  ;;  %261 = vmatpush.msra.mxu2 %v92_v61  ;;  %v133_v32 = vld [vmem:[%s1020_s1 + $0x248] sm:$0xff]  ;;  %v150_v33 = vld [vmem:[%s1020_s1 + $0x2d0] sm:$0xff]  ;;  %v164_v34 = vld [vmem:[%s1020_s1 + $0x340] sm:$0xff] }
  0x22   :  { %204 = vmatmul.f32.vlgmr.msra.gmra.mxu0 %v28_v62  ;;  %262 = vmatmul.f32.vlgmr.msra.gmra.mxu2 %v30_v63  ;;  %v181_v35 = vld [vmem:[%s1020_s1 + $0x3c8] sm:$0xff]  ;;  %v132_v36 = vld [vmem:[%s1020_s1 + $0x240] sm:$0xff]  ;;  %v46_v39 = vld [vmem:[%s1019_s0 + $0x90] sm:$0xff] }
  0x23   :  { %362 = vmatpush.msrb.mxu2 %v171_v0  ;;  %232 = vmatpush.msra.mxu1 %v76_v1  ;;  %v149_v37 = vld [vmem:[%s1020_s1 + $0x2c8] sm:$0xff]  ;;  %v44_v38 = vld [vmem:[%s1019_s0 + $0x80] sm:$0xff]  ;;  %v163_v40 = vld [vmem:[%s1020_s1 + $0x338] sm:$0xff] }
  0x24   :  { %290 = vmatpush.msra.mxu3 %v108_v2  ;;  %304 = vmatpush.msrb.mxu0 %v139_v3  ;;  %v180_v41 = vld [vmem:[%s1020_s1 + $0x3c0] sm:$0xff]  ;;  %v131_v42 = vld [vmem:[%s1020_s1 + $0x238] sm:$0xff] }
  0x25   :  { %233 = vmatmul.f32.vlgmr.msra.gmra.mxu1 %v29_v4  ;;  %291 = vmatmul.f32.vlgmr.msra.gmra.mxu3 %v31_v5  ;;  %v148_v43 = vld [vmem:[%s1020_s1 + $0x2c0] sm:$0xff] }
  0x26   :  { %363 = vmatpush.msrb.mxu2 %v170_v6  ;;  %391 = vmatpush.msrb.mxu3 %v187_v7 }
  0x27   :  { %305 = vmatpush.msrb.mxu0 %v138_v8  ;;  %333 = vmatpush.msrb.mxu1 %v155_v9 }
  0x28   :  { %364 = vmatpush.msrb.mxu2 %v169_v10  ;;  %392 = vmatpush.msrb.mxu3 %v186_v11 }
  0x29   :  { %306 = vmatpush.msrb.mxu0 %v137_v12  ;;  %334 = vmatpush.msrb.mxu1 %v154_v13 }
  0x2a   :  { %365 = vmatpush.msrb.mxu2 %v168_v14  ;;  %393 = vmatpush.msrb.mxu3 %v185_v15 }
  0x2b   :  { %307 = vmatpush.msrb.mxu0 %v136_v16  ;;  %335 = vmatpush.msrb.mxu1 %v153_v17 }
  0x2c   :  { %207 = vmatmul.f32.gmra.mxu0 %v36_v18  ;;  %265 = vmatmul.f32.gmra.mxu2 %v38_v19 }
  0x2d   :  { %366 = vmatpush.msrb.mxu2 %v167_v20  ;;  %394 = vmatpush.msrb.mxu3 %v184_v21 }
  0x2e   :  { %308 = vmatpush.msrb.mxu0 %v135_v22  ;;  %336 = vmatpush.msrb.mxu1 %v152_v23 }
  0x2f   :  { %236 = vmatmul.f32.gmra.mxu1 %v37_v24  ;;  %294 = vmatmul.f32.gmra.mxu3 %v39_v25 }
  0x30   :  { %367 = vmatpush.msrb.mxu2 %v166_v26  ;;  %395 = vmatpush.msrb.mxu3 %v183_v27 }
  0x31   :  { %309 = vmatpush.msrb.mxu0 %v134_v28  ;;  %337 = vmatpush.msrb.mxu1 %v151_v29 }
  0x32   :  { %368 = vmatpush.msrb.mxu2 %v165_v30  ;;  %396 = vmatpush.msrb.mxu3 %v182_v31 }
  0x33   :  { %310 = vmatpush.msrb.mxu0 %v133_v32  ;;  %338 = vmatpush.msrb.mxu1 %v150_v33 }
  0x34   :  { %369 = vmatpush.msrb.mxu2 %v164_v34  ;;  %397 = vmatpush.msrb.mxu3 %v181_v35 }
  0x35   :  { %311 = vmatpush.msrb.mxu0 %v132_v36  ;;  %339 = vmatpush.msrb.mxu1 %v149_v37 }
  0x36   :  { %8 = vsyncpa [#allocation4], 0  ;;  %210 = vmatmul.f32.gmra.mxu0 %v44_v38  ;;  %268 = vmatmul.f32.gmra.mxu2 %v46_v39  ;;  %v45_v44 = vld [vmem:[%s1019_s0 + $0x88] sm:$0xff]  ;;  %v47_v45 = vld [vmem:[%s1019_s0 + $0x98] sm:$0xff]  ;;  %vm19_vm0 = vcmask 261120   ;;  %v497_v37 = vmov 0.0  }
  0x37   :  { %370 = vmatpush.msrb.mxu2 %v163_v40  ;;  %398 = vmatpush.msrb.mxu3 %v180_v41  ;;  %v162_v46 = vld [vmem:[%s1020_s1 + $0x330] sm:$0xff]  ;;  %v179_v47 = vld [vmem:[%s1020_s1 + $0x3b8] sm:$0xff]  ;;  %v161_v50 = vld [vmem:[%s1020_s1 + $0x328] sm:$0xff]  ;;  %20 = vst.msk [vmem:[#allocation2] sm:$0xff] %vm19_vm0, %v497_v37  ;;  %s454_s11 = sshll.u32 %s1022_s3, 4  ;;  %s499_s12 = smov 128   ;;  %s455_s11 = int_to_ptr.hbm [resolvable:$true] %s454_s11 }
  0x38   :  { %312 = vmatpush.msrb.mxu0 %v131_v42  ;;  %340 = vmatpush.msrb.mxu1 %v148_v43  ;;  %v130_v48 = vld [vmem:[%s1020_s1 + $0x230] sm:$0xff]  ;;  %v147_v49 = vld [vmem:[%s1020_s1 + $0x2b8] sm:$0xff]  ;;  %v129_v52 = vld [vmem:[%s1020_s1 + $0x228] sm:$0xff]  ;;  %21 = vst.msk [vmem:[#allocation2 + $0x8] sm:$0xff] %vm19_vm0, %v497_v37 }
  0x39   :  { %239 = vmatmul.f32.gmra.mxu1 %v45_v44  ;;  %297 = vmatmul.f32.gmra.mxu3 %v47_v45  ;;  %v178_v51 = vld [vmem:[%s1020_s1 + $0x3b0] sm:$0xff]  ;;  %v160_v54 = vld [vmem:[%s1020_s1 + $0x320] sm:$0xff]  ;;  %v177_v55 = vld [vmem:[%s1020_s1 + $0x3a8] sm:$0xff]  ;;  %22 = vst.msk [vmem:[#allocation2 + $0x10] sm:$0xff] %vm19_vm0, %v497_v37 }
  0x3a   :  { %371 = vmatpush.msrb.mxu2 %v162_v46  ;;  %399 = vmatpush.msrb.mxu3 %v179_v47  ;;  %v146_v53 = vld [vmem:[%s1020_s1 + $0x2b0] sm:$0xff]  ;;  %v128_v56 = vld [vmem:[%s1020_s1 + $0x220] sm:$0xff]  ;;  %v145_v57 = vld [vmem:[%s1020_s1 + $0x2a8] sm:$0xff]  ;;  %23 = vst.msk [vmem:[#allocation2 + $0x18] sm:$0xff] %vm19_vm0, %v497_v37 }
  0x3b   :  { %313 = vmatpush.msrb.mxu0 %v130_v48  ;;  %341 = vmatpush.msrb.mxu1 %v147_v49  ;;  %v52_v58 = vld [vmem:[%s1019_s0 + $0xc0] sm:$0xff]  ;;  %v54_v59 = vld [vmem:[%s1019_s0 + $0xd0] sm:$0xff]  ;;  %v159_v60 = vld [vmem:[%s1020_s1 + $0x318] sm:$0xff] }
  0x3c   :  { %372 = vmatpush.msrb.mxu2 %v161_v50  ;;  %400 = vmatpush.msrb.mxu3 %v178_v51  ;;  %v176_v61 = vld [vmem:[%s1020_s1 + $0x3a0] sm:$0xff]  ;;  %v127_v62 = vld [vmem:[%s1020_s1 + $0x218] sm:$0xff]  ;;  %v53_v0 = vld [vmem:[%s1019_s0 + $0xc8] sm:$0xff] }
  0x3d   :  { %314 = vmatpush.msrb.mxu0 %v129_v52  ;;  %342 = vmatpush.msrb.mxu1 %v146_v53  ;;  %v144_v63 = vld [vmem:[%s1020_s1 + $0x2a0] sm:$0xff]  ;;  %v55_v1 = vld [vmem:[%s1019_s0 + $0xd8] sm:$0xff]  ;;  %v158_v2 = vld [vmem:[%s1020_s1 + $0x310] sm:$0xff] }
  0x3e   :  { %373 = vmatpush.msrb.mxu2 %v160_v54  ;;  %401 = vmatpush.msrb.mxu3 %v177_v55  ;;  %v175_v3 = vld [vmem:[%s1020_s1 + $0x398] sm:$0xff]  ;;  %v126_v4 = vld [vmem:[%s1020_s1 + $0x210] sm:$0xff]  ;;  %v157_v6 = vld [vmem:[%s1020_s1 + $0x308] sm:$0xff] }
  0x3f   :  { %315 = vmatpush.msrb.mxu0 %v128_v56  ;;  %343 = vmatpush.msrb.mxu1 %v145_v57  ;;  %v143_v5 = vld [vmem:[%s1020_s1 + $0x298] sm:$0xff]  ;;  %v174_v7 = vld [vmem:[%s1020_s1 + $0x390] sm:$0xff]  ;;  %v125_v8 = vld [vmem:[%s1020_s1 + $0x208] sm:$0xff] }
  0x40   :  { %213 = vmatmul.f32.gmra.mxu0 %v52_v58  ;;  %271 = vmatmul.f32.gmra.mxu2 %v54_v59  ;;  %v142_v9 = vld [vmem:[%s1020_s1 + $0x290] sm:$0xff]  ;;  %v156_v10 = vld [vmem:[%s1020_s1 + $0x300] sm:$0xff]  ;;  %v173_v11 = vld [vmem:[%s1020_s1 + $0x388] sm:$0xff] }
  0x41   :  { %374 = vmatpush.msrb.mxu2 %v159_v60  ;;  %402 = vmatpush.msrb.mxu3 %v176_v61  ;;  %v124_v12 = vld [vmem:[%s1020_s1 + $0x200] sm:$0xff]  ;;  %v141_v13 = vld [vmem:[%s1020_s1 + $0x288] sm:$0xff]  ;;  %v34_v15 = vld [vmem:[%s1019_s0 + $0x30] sm:$0xff] }
  0x42   :  { %316 = vmatpush.msrb.mxu0 %v127_v62  ;;  %344 = vmatpush.msrb.mxu1 %v144_v63  ;;  %v32_v14 = vld [vmem:[%s1019_s0 + $0x20] sm:$0xff]  ;;  %v33_v18 = vld [vmem:[%s1019_s0 + $0x28] sm:$0xff]  ;;  %v35_v19 = vld [vmem:[%s1019_s0 + $0x38] sm:$0xff] }
  0x43   :  { %242 = vmatmul.f32.gmra.mxu1 %v53_v0  ;;  %300 = vmatmul.f32.gmra.mxu3 %v55_v1  ;;  %v172_v16 = vld [vmem:[%s1020_s1 + $0x380] sm:$0xff]  ;;  %v42_v21 = vld [vmem:[%s1019_s0 + $0x70] sm:$0xff]  ;;  %v41_v22 = vld [vmem:[%s1019_s0 + $0x68] sm:$0xff] }
  0x44   :  { %375 = vmatpush.msrb.mxu2 %v158_v2  ;;  %403 = vmatpush.msrb.mxu3 %v175_v3  ;;  %v140_v17 = vld [vmem:[%s1020_s1 + $0x280] sm:$0xff]  ;;  %v43_v23 = vld [vmem:[%s1019_s0 + $0x78] sm:$0xff]  ;;  %v50_v25 = vld [vmem:[%s1019_s0 + $0xb0] sm:$0xff]  ;;  %s500_s1 = smov 8  }
  0x45   :  { %317 = vmatpush.msrb.mxu0 %v126_v4  ;;  %345 = vmatpush.msrb.mxu1 %v143_v5  ;;  %v40_v20 = vld [vmem:[%s1019_s0 + $0x60] sm:$0xff]  ;;  %v49_v26 = vld [vmem:[%s1019_s0 + $0xa8] sm:$0xff]  ;;  %v51_v27 = vld [vmem:[%s1019_s0 + $0xb8] sm:$0xff] }
  0x46   :  { %376 = vmatpush.msrb.mxu2 %v157_v6  ;;  %404 = vmatpush.msrb.mxu3 %v174_v7  ;;  %v48_v24 = vld [vmem:[%s1019_s0 + $0xa0] sm:$0xff]  ;;  %v58_v29 = vld [vmem:[%s1019_s0 + $0xf0] sm:$0xff]  ;;  %v57_v30 = vld [vmem:[%s1019_s0 + $0xe8] sm:$0xff] }
  0x47   :  { %318 = vmatpush.msrb.mxu0 %v125_v8  ;;  %346 = vmatpush.msrb.mxu1 %v142_v9  ;;  %v56_v28 = vld [vmem:[%s1019_s0 + $0xe0] sm:$0xff]  ;;  %v59_v31 = vld [vmem:[%s1019_s0 + $0xf8] sm:$0xff] }
  0x48   :  { %377 = vmatpush.msrb.mxu2 %v156_v10  ;;  %405 = vmatpush.msrb.mxu3 %v173_v11  ;;  %v24_v62 = vld [vmem:[#allocation2] sm:$0xff]  ;;  %v25_v11 = vld [vmem:[#allocation2 + $0x8] sm:$0xff] }
  0x49   :  { %319 = vmatpush.msrb.mxu0 %v124_v12  ;;  %347 = vmatpush.msrb.mxu1 %v141_v13 }
  0x4a   :  { %320 = vmatmul.f32.vlgmr.msrb.gmra.mxu0 %v32_v14  ;;  %378 = vmatmul.f32.vlgmr.msrb.gmra.mxu2 %v34_v15 }
  0x4b   :  { %406 = vmatpush.msrb.mxu3 %v172_v16  ;;  %348 = vmatpush.msrb.mxu1 %v140_v17  ;;  %v470_v16 = vld [vmem:[%s1021_s2] ss:$0 sm:$0xff]  ;;  %s498_s2 = smov [#allocation3]  }
  0x4c   :  { %349 = vmatmul.f32.vlgmr.msrb.gmra.mxu1 %v33_v18  ;;  %407 = vmatmul.f32.vlgmr.msrb.gmra.mxu3 %v35_v19  ;;  %s452_s8 = sshll.u32 %s498_s2, 4  ;;  %s453_s8 = int_to_ptr.vmem [resolvable:$true] %s452_s8 }
  0x52   :  { %323 = vmatmul.f32.gmra.mxu0 %v40_v20  ;;  %381 = vmatmul.f32.gmra.mxu2 %v42_v21 }
  0x54   :  { %352 = vmatmul.f32.gmra.mxu1 %v41_v22  ;;  %410 = vmatmul.f32.gmra.mxu3 %v43_v23 }
  0x5a   :  { %326 = vmatmul.f32.gmra.mxu0 %v48_v24  ;;  %384 = vmatmul.f32.gmra.mxu2 %v50_v25 }
  0x5c   :  { %355 = vmatmul.f32.gmra.mxu1 %v49_v26  ;;  %413 = vmatmul.f32.gmra.mxu3 %v51_v27  ;;  %v26_v27 = vld [vmem:[#allocation2 + $0x10] sm:$0xff] }
  0x62   :  { %329 = vmatmul.f32.gmra.mxu0 %v56_v28  ;;  %387 = vmatmul.f32.gmra.mxu2 %v58_v29 }
  0x64   :  { %358 = vmatmul.f32.gmra.mxu1 %v57_v30  ;;  %416 = vmatmul.f32.gmra.mxu3 %v59_v31 }
  0x9f   :  { %v205_v32 = vpop.f32.mrf.mxu0 }
  0xa2   :  { %v234_v33 = vpop.f32.mrf.mxu1 }
  0xa3   :  { %v235_v46 = vadd.f32 %v234_v33, %v205_v32 }
  0xa5   :  { %v263_v34 = vpop.f32.mrf.mxu2 }
  0xa6   :  { %v264_v48 = vadd.f32 %v263_v34, %v235_v46 }
  0xa8   :  { %v292_v35 = vpop.f32.mrf.mxu3 }
  0xa9   :  { %v208_v36 = vpop.f32.mrf.mxu0  ;;  %v293_v50 = vadd.f32 %v292_v35, %v264_v48 }
  0xac   :  { %v237_v38 = vpop.f32.mrf.mxu1 }
  0xad   :  { %v238_v53 = vadd.f32 %v237_v38, %v208_v36  ;;  %v27_v38 = vld [vmem:[#allocation2 + $0x18] sm:$0xff] }
  0xaf   :  { %v266_v39 = vpop.f32.mrf.mxu2 }
  0xb0   :  { %v267_v56 = vadd.f32 %v266_v39, %v238_v53 }
  0xb2   :  { %v295_v40 = vpop.f32.mrf.mxu3 }
  0xb3   :  { %v211_v41 = vpop.f32.mrf.mxu0  ;;  %v296_v59 = vadd.f32 %v295_v40, %v267_v56 }
  0xb6   :  { %v240_v42 = vpop.f32.mrf.mxu1 }
  0xb7   :  { %v241_v0 = vadd.f32 %v240_v42, %v211_v41 }
  0xb9   :  { %v269_v43 = vpop.f32.mrf.mxu2 }
  0xba   :  { %v270_v4 = vadd.f32 %v269_v43, %v241_v0 }
  0xbc   :  { %v298_v44 = vpop.f32.mrf.mxu3 }
  0xbd   :  { %v214_v45 = vpop.f32.mrf.mxu0  ;;  %v299_v8 = vadd.f32 %v298_v44, %v270_v4 }
  0xc0   :  { %v243_v47 = vpop.f32.mrf.mxu1 }
  0xc1   :  { %v244_v13 = vadd.f32 %v243_v47, %v214_v45 }
  0xc3   :  { %v272_v49 = vpop.f32.mrf.mxu2 }
  0xc4   :  { %v273_v18 = vadd.f32 %v272_v49, %v244_v13 }
  0xc6   :  { %v301_v51 = vpop.f32.mrf.mxu3 }
  0xc7   :  { %v321_v52 = vpop.f32.mrf.mxu0  ;;  %v302_v24 = vadd.f32 %v301_v51, %v273_v18 }
  0xc8   :  { %v322_v54 = vadd.f32 %v321_v52, %v293_v50 }
  0xc9   :  { %v350_v55 = vpop.f32.mrf.mxu1 }
  0xca   :  { %v351_v57 = vadd.f32 %v350_v55, %v322_v54 }
  0xcd   :  { %v379_v58 = vpop.f32.mrf.mxu2 }
  0xce   :  { %v380_v60 = vadd.f32 %v379_v58, %v351_v57 }
  0xcf   :  { %v324_v61 = vpop.f32.mrf.mxu0  ;;  %v408_v63 = vpop.f32.mrf.mxu3 }
  0xd0   :  { %v325_v1 = vadd.f32 %v324_v61, %v296_v59  ;;  %v409_v2 = vadd.f32 %v408_v63, %v380_v60 }
  0xd1   :  { %v353_v3 = vpop.f32.mrf.mxu1 }
  0xd2   :  { %v420_v5 = vadd.f32 %v409_v2, %v24_v62  ;;  %v354_v6 = vadd.f32 %v353_v3, %v325_v1 }
  0xd4   :  { %425 = vst.msk [vmem:[#allocation2] sm:$0xff] %vm19_vm0, %v420_v5 }
  0xd5   :  { %v382_v7 = vpop.f32.mrf.mxu2 }
  0xd6   :  { %v383_v9 = vadd.f32 %v382_v7, %v354_v6 }
  0xd7   :  { %v327_v10 = vpop.f32.mrf.mxu0  ;;  %v411_v12 = vpop.f32.mrf.mxu3 }
  0xd8   :  { %v328_v14 = vadd.f32 %v327_v10, %v299_v8  ;;  %v412_v15 = vadd.f32 %v411_v12, %v383_v9 }
  0xd9   :  { %v356_v17 = vpop.f32.mrf.mxu1 }
  0xda   :  { %v421_v19 = vadd.f32 %v412_v15, %v25_v11  ;;  %v357_v21 = vadd.f32 %v356_v17, %v328_v14 }
  0xdb   :  { %v432_v20 = vld [vmem:[#allocation2] sm:$0xff] }
  0xdc   :  { %426 = vst.msk [vmem:[#allocation2 + $0x8] sm:$0xff] %vm19_vm0, %v421_v19  ;;  %v440_v22 = vadd.f32 %v470_v16, %v432_v20 }
  0xdd   :  { %v385_v23 = vpop.f32.mrf.mxu2 }
  0xde   :  { %v386_v25 = vadd.f32 %v385_v23, %v357_v21  ;;  %444 = vst.msk [vmem:[#allocation3] sm:$0xff] %vm19_vm0, %v440_v22 }
  0xdf   :  { %v330_v26 = vpop.f32.mrf.mxu0  ;;  %v414_v28 = vpop.f32.mrf.mxu3 }
  0xe0   :  { %v331_v29 = vadd.f32 %v330_v26, %v302_v24  ;;  %v415_v30 = vadd.f32 %v414_v28, %v386_v25 }
  0xe1   :  { %v359_v31 = vpop.f32.mrf.mxu1 }
  0xe2   :  { %v422_v32 = vadd.f32 %v415_v30, %v26_v27  ;;  %v360_v34 = vadd.f32 %v359_v31, %v331_v29 }
  0xe3   :  { %v433_v33 = vld [vmem:[#allocation2 + $0x8] sm:$0xff] }
  0xe4   :  { %427 = vst.msk [vmem:[#allocation2 + $0x10] sm:$0xff] %vm19_vm0, %v422_v32  ;;  %v441_v35 = vadd.f32 %v470_v16, %v433_v33 }
  0xe5   :  { %v388_v36 = vpop.f32.mrf.mxu2 }
  0xe6   :  { %v389_v37 = vadd.f32 %v388_v36, %v360_v34  ;;  %445 = vst.msk [vmem:[#allocation3 + $0x8] sm:$0xff] %vm19_vm0, %v441_v35 }
  0xe7   :  { %v417_v39 = vpop.f32.mrf.mxu3 }
  0xe8   :  { %v418_v40 = vadd.f32 %v417_v39, %v389_v37 }
  0xea   :  { %v423_v41 = vadd.f32 %v418_v40, %v27_v38 }
  0xeb   :  { %v434_v42 = vld [vmem:[#allocation2 + $0x10] sm:$0xff] }
  0xec   :  { %428 = vst.msk [vmem:[#allocation2 + $0x18] sm:$0xff] %vm19_vm0, %v423_v41  ;;  %v442_v43 = vadd.f32 %v470_v16, %v434_v42 }
  0xee   :  { %446 = vst.msk [vmem:[#allocation3 + $0x10] sm:$0xff] %vm19_vm0, %v442_v43 }
  0xf3   :  { %v435_v44 = vld [vmem:[#allocation2 + $0x18] sm:$0xff] }
  0xf4   :  { %v443_v45 = vadd.f32 %v470_v16, %v435_v44 }
  0xf6   :  { %447 = vst.msk [vmem:[#allocation3 + $0x18] sm:$0xff] %vm19_vm0, %v443_v45 }
  0xf7   :  { %460 = dma.vmem_to_hbm [thread:$0]  %s453_s8, 512, %s455_s11, [#allocation4], %s499_s12, %s499_s12, %s500_s1  }
  0xf8   :  { %495 = dma.done.wait [#allocation4], 512  }
  0xf9   :  { %496 = vsyncadd [#allocation4], 4294966784 }
  0xfa   :  { %465 = vsyncpa [#allocation4], 1 }

</bundles_post_ra>
